<compile_context>
chip_gen: v6e
topology: v6e:2x2x1
jax: 0.10.0
libtpu: 0.0.40
codegen_flags: <defaults>
</compile_context>

<pallas_src>
import math

import jax
import jax.numpy as jnp
from jax.experimental import pallas as pl
from jax.experimental.pallas import tpu as pltpu


_LANE = 128          # lane width (last dim granularity)
_SUBLANE_F32 = 8     # sublane granularity for f32 blocks
_SUBLANE_BF16 = 16   # bf16 packs 2 rows per sublane
_TM_CAP = 512
_TN_CAP = 512
_TK_CAP = 1024


# ---------------------------------------------------------------------------
# Kernel: one (tm, tn) output tile, K reduced over grid axis 2.
# Output block is resident across k (out index_map ignores k), so we
# accumulate directly into o_ref (f32) — no scratch, no final copy.
# ---------------------------------------------------------------------------
def _linear_kernel(x_ref, w_ref, o_ref):
    k = pl.program_id(2)

    @pl.when(k == 0)
    def _():
        o_ref[...] = jnp.zeros_like(o_ref)

    o_ref[...] += jnp.dot(
        x_ref[...], w_ref[...], preferred_element_type=jnp.float32
    )


# ---------------------------------------------------------------------------
# Tiling helpers
# ---------------------------------------------------------------------------
def _round_up(x, m):
    return ((x + m - 1) // m) * m


def _largest_aligned_divisor(x, gran, cap):
    """Largest d with d % gran == 0, d | x, d <= cap (x must be a multiple of gran)."""
    q = x // gran
    t_max = min(q, max(cap // gran, 1))
    for t in range(t_max, 0, -1):
        if q % t == 0:
            return t * gran
    return gran


def _pick_tiles(m_pad, k_pad, n_pad, m_gran):
    tm = _largest_aligned_divisor(m_pad, m_gran, _TM_CAP)
    tk = _largest_aligned_divisor(k_pad, _LANE, _TK_CAP)
    tn = _largest_aligned_divisor(n_pad, _LANE, _TN_CAP)
    # v7x has 2 TensorCores sharded over the "parallel" axes: make sure there
    # are at least 2 parallel blocks when M allows it (no-op on v5e/v6e).
    if (m_pad // tm) * (n_pad // tn) < 2 and m_pad >= 2 * m_gran:
        tm = _largest_aligned_divisor(m_pad, m_gran, max(m_pad // 2, m_gran))
    return tm, tk, tn


# ---------------------------------------------------------------------------
# Weight preparation (do once per parameter; fixed 128x128 granularity so the
# result is valid for any tile choice / TPU generation).
# ---------------------------------------------------------------------------
def prepare_weight(weight, compute_dtype=jnp.float32):
    """PyTorch-layout (output_dim, input_dim) -> padded, transposed (K_pad, N_pad)."""
    out_dim, in_dim = weight.shape
    k_pad = _round_up(in_dim, _LANE)
    n_pad = _round_up(out_dim, _LANE)
    w_t = weight.T.astype(compute_dtype)            # (in_dim, out_dim)
    if (in_dim, out_dim) != (k_pad, n_pad):
        w_t = jnp.pad(w_t, ((0, k_pad - in_dim), (0, n_pad - out_dim)))
    return w_t


# ---------------------------------------------------------------------------
# Forward pass
# ---------------------------------------------------------------------------
def linear_regression_forward(x, weight, *, compute_dtype=None,
                              allow_xla_fallback=True):
    """y = x @ weight.T

    x:      (batch, input_dim)
    weight: (output_dim, input_dim)  (PyTorch nn.Linear layout)
    compute_dtype: optional streaming dtype (e.g. jnp.bfloat16); accumulation
                   and the returned result stay float32.
    """
    batch, input_dim = x.shape
    output_dim, w_in = weight.shape
    assert w_in == input_dim

    compute_dtype = jnp.dtype(compute_dtype) if compute_dtype else x.dtype
    m_gran = _SUBLANE_BF16 if compute_dtype == jnp.bfloat16 else _SUBLANE_F32

    m_pad = _round_up(batch, m_gran)
    k_pad = _round_up(input_dim, _LANE)
    n_pad = _round_up(output_dim, _LANE)

    tm, tk, tn = _pick_tiles(m_pad, k_pad, n_pad, m_gran)
    grid = (m_pad // tm, n_pad // tn, k_pad // tk)

    # Tiny single-block problems: pallas_call + pad/slice overhead exceeds the
    # work itself — let XLA handle it.
    if allow_xla_fallback and grid == (1, 1, 1):
        return jnp.dot(x, weight.T, preferred_element_type=jnp.float32)

    # Pad activations only to the (sublane, lane) hardware minimum.
    x_c = x.astype(compute_dtype)
    if (batch, input_dim) != (m_pad, k_pad):
        x_c = jnp.pad(x_c, ((0, m_pad - batch), (0, k_pad - input_dim)))

    w_pad = prepare_weight(weight, compute_dtype)

    itemsize = jnp.dtype(compute_dtype).itemsize
    flops = 2 * m_pad * k_pad * n_pad
    bytes_accessed = (itemsize * (m_pad * k_pad * (n_pad // tn)     # x re-reads
                                  + k_pad * n_pad * (m_pad // tm))  # w re-reads
                      + 4 * m_pad * n_pad)                          # f32 output

    # Explicit scoped-VMEM limit sized from the real double-buffered footprint
    # (inputs double-buffered in compute_dtype, f32 output double-buffered),
    # capped at 48 MiB to keep >=25% headroom on v7x's 64 MiB physical VMEM.
    footprint = 2 * (tm * tk + tk * tn) * itemsize + 2 * tm * tn * 4
    vmem_limit = int(min(max(2 * footprint, 32 * 1024 * 1024), 48 * 1024 * 1024))

    y_pad = pl.pallas_call(
        _linear_kernel,
        out_shape=jax.ShapeDtypeStruct((m_pad, n_pad), jnp.float32),
        grid_spec=pltpu.PrefetchScalarGridSpec(
            num_scalar_prefetch=0,
            grid=grid,
            in_specs=[
                pl.BlockSpec((tm, tk), lambda i, j, k: (i, k)),
                pl.BlockSpec((tk, tn), lambda i, j, k: (k, j)),
            ],
            out_specs=pl.BlockSpec((tm, tn), lambda i, j, k: (i, j)),
        ),
        compiler_params=pltpu.CompilerParams(
            dimension_semantics=("parallel", "parallel", "arbitrary"),
            vmem_limit_bytes=vmem_limit,
        ),
        cost_estimate=pl.CostEstimate(
            flops=flops, transcendentals=0, bytes_accessed=int(bytes_accessed)
        ),
    )(x_c, w_pad)

    if (m_pad, n_pad) != (batch, output_dim):
        y_pad = y_pad[:batch, :output_dim]
    return y_pad


def xavier_uniform(key, out_dim, in_dim, dtype=jnp.float32):
    # Matches torch.nn.init.xavier_uniform_ for a (out_dim, in_dim) weight.
    bound = math.sqrt(6.0 / (in_dim + out_dim))
    return jax.random.uniform(
        key, (out_dim, in_dim), dtype=dtype, minval=-bound, maxval=bound
    )


if __name__ == "__main__":
    key = jax.random.PRNGKey(0)
    k_w, k_x, k_w2, k_x2 = jax.random.split(key, 4)

    # Small shape matching the module defaults (output_dim=1). Fallback is
    # disabled so the Pallas kernel itself is exercised.
    batch, input_dim, output_dim = 8, 32, 1
    weight = xavier_uniform(k_w, output_dim, input_dim)          # (1, 32)
    x = jax.random.normal(k_x, (batch, input_dim), jnp.float32)  # (8, 32)

    y = linear_regression_forward(x, weight, allow_xla_fallback=False)
    jax.block_until_ready(y)
    y_ref = x @ weight.T
    assert y.shape == (batch, output_dim)
    assert jnp.allclose(y, y_ref, atol=1e-5, rtol=1e-5)

    # Ragged multi-tile shape: exercises divisor-based tiling with NO
    # tile-multiple padding (m=600 -> tm=200, k=520 -> k_pad=640/tk=640,
    # n=300 -> n_pad=384/tn=384, grid (3,1,1)).
    w2 = xavier_uniform(k_w2, 300, 520)                          # (300, 520)
    x2 = jax.random.normal(k_x2, (600, 520), jnp.float32)        # (600, 520)
    y2 = linear_regression_forward(x2, w2)
    jax.block_until_ready(y2)
    y2_ref = x2 @ w2.T
    assert jnp.allclose(y2, y2_ref, atol=1e-3, rtol=1e-3)

    # Optional bf16 streaming path (halves HBM bytes; f32 accumulation).
    y3 = linear_regression_forward(x2, w2, compute_dtype=jnp.bfloat16)
    jax.block_until_ready(y3)
    assert jnp.allclose(y3, y2_ref, atol=5e-2, rtol=5e-2)

    print("KERNEL_OK")
</pallas_src>

<mosaic_0001>
module attributes {stable_mosaic.version = 11 : i64} {
  func.func @_linear_kernel(%arg0: i32, %arg1: i32, %arg2: i32, %arg3: memref<8x128xf32, #tpu.memory_space<vmem>>, %arg4: memref<128x128xf32, #tpu.memory_space<vmem>>, %arg5: memref<8x128xf32, #tpu.memory_space<vmem>>) attributes {dimension_semantics = [#tpu.dimension_semantics<parallel>, #tpu.dimension_semantics<parallel>, #tpu.dimension_semantics<arbitrary>], iteration_bounds = array<i64: 1, 1, 1>, scalar_prefetch = 0 : i64, scratch_operands = 0 : i64, tpu.core_type = #tpu.core_type<tc>, window_params = [{transform_indices = @transform_0, window_bounds = array<i64: 8, 128>}, {transform_indices = @transform_1, window_bounds = array<i64: 128, 128>}, {transform_indices = @transform_2, window_bounds = array<i64: 8, 128>}]} {
    %c0_i32 = arith.constant 0 : i32
    %0 = arith.cmpi eq, %arg2, %c0_i32 : i32
    %1 = arith.extui %0 : i1 to i32
    %c0_i32_0 = arith.constant 0 : i32
    %2 = arith.cmpi ne, %1, %c0_i32_0 : i32
    scf.if %2 {
      %cst_8 = arith.constant 0.000000e+00 : f32
      %9 = vector.broadcast %cst_8 : f32 to vector<8x128xf32>
      %c0_9 = arith.constant 0 : index
      %c0_10 = arith.constant 0 : index
      %10 = vector.load %arg5[%c0_9, %c0_10] : memref<8x128xf32, #tpu.memory_space<vmem>>, vector<8x128xf32>
      tpu.vector_store %arg5[%c0_9, %c0_10], %9 {strides = array<i32>} : memref<8x128xf32, #tpu.memory_space<vmem>>, vector<8x128xf32>,
    } else {
    }
    %c0 = arith.constant 0 : index
    %c0_1 = arith.constant 0 : index
    %3 = vector.load %arg5[%c0, %c0_1] : memref<8x128xf32, #tpu.memory_space<vmem>>, vector<8x128xf32>
    %c0_2 = arith.constant 0 : index
    %c0_3 = arith.constant 0 : index
    %4 = vector.load %arg3[%c0_2, %c0_3] : memref<8x128xf32, #tpu.memory_space<vmem>>, vector<8x128xf32>
    %c0_4 = arith.constant 0 : index
    %c0_5 = arith.constant 0 : index
    %5 = vector.load %arg4[%c0_4, %c0_5] : memref<128x128xf32, #tpu.memory_space<vmem>>, vector<128x128xf32>
    %cst = arith.constant dense<0.000000e+00> : vector<8x128xf32>
    %6 = tpu.matmul %4, %5, %cst {dimension_numbers = #tpu.dot_dimension_numbers<[1], [0], [0], [1], [0, 0, 1, 1], [], []>} : vector<8x128xf32>, vector<128x128xf32>, vector<8x128xf32> -> vector<8x128xf32>
    %7 = arith.addf %3, %6 : vector<8x128xf32>
    %c0_6 = arith.constant 0 : index
    %c0_7 = arith.constant 0 : index
    %8 = vector.load %arg5[%c0_6, %c0_7] : memref<8x128xf32, #tpu.memory_space<vmem>>, vector<8x128xf32>
    tpu.vector_store %arg5[%c0_6, %c0_7], %7 {strides = array<i32>} : memref<8x128xf32, #tpu.memory_space<vmem>>, vector<8x128xf32>,
    return
  }
  func.func @transform_0(%arg0: i32, %arg1: i32, %arg2: i32) -> (i32, i32) {
    %c0_i32 = arith.constant 0 : i32
    return %arg0, %arg2 : i32, i32
  }
  func.func @transform_1(%arg0: i32, %arg1: i32, %arg2: i32) -> (i32, i32) {
    %c0_i32 = arith.constant 0 : i32
    return %arg2, %arg1 : i32, i32
  }
  func.func @transform_2(%arg0: i32, %arg1: i32, %arg2: i32) -> (i32, i32) {
    %c0_i32 = arith.constant 0 : i32
    return %arg0, %arg1 : i32, i32
  }
}

</mosaic_0001>

<bundles_post_ra>
// kernel: tpu_custom_call.1
= control target key start
LH: loop header
LB: loop body
LE: loop exit
PB: predicated region body
PF: predicated region fallthrough
CT: control target
= control target key end

     0   :  { %7 = vsyncpa [#allocation3], 0  ;;  %s305_s0 = inlined_call_operand.hbm [shape: f32[8,128], index: 0, kind: input, shape index: {}]   ;;  %s306_s1 = inlined_call_operand.hbm [shape: f32[128,128], index: 1, kind: input, shape index: {}]   ;;  %s307_s2 = inlined_call_operand.hbm [shape: f32[8,128], index: 2, kind: output, shape index: {}]  }
   0x1   :  { %8 = vsyncpa [#allocation6], 0 }
   0x2   :  { %9 = vsyncpa [#allocation4], 0  ;;  %s274_s9 = smov [#allocation2]   ;;  %s275_s11 = smov [#allocation5]  }
   0x3   :  { %s16_s10 = sshll.u32 %s274_s9, 4  ;;  %s25_s12 = sshll.u32 %s275_s11, 4  ;;  %s17_s10 = int_to_ptr.vmem [resolvable:$true] %s16_s10  ;;  %s26_s12 = int_to_ptr.vmem [resolvable:$true] %s25_s12 }
   0x4   :  { %s216_s13 = scalar_lea.vmem %s17_s10, 128  ;;  %p221_p1 = scmp.lt.s32.totalorder %s17_s10, %s17_s10 }
   0x5   :  { %p217_p0 = scmp.ne.s32.totalorder %s17_s10, %s216_s13  ;;  %p222_p2 = scmp.lt.s32.totalorder %s216_s13, %s216_s13 }
   0x7   :  { %p223_p3 = por %p222_p2, %p221_p1 }
   0x9   :  { %p224_p4 = pnand %p223_p3, %p217_p0 }
   0xb   :  { %227 = shalt.err (!%p224_p4)
}
   0xc   :  { %19 = dma.hbm_to_vmem [thread:$0]  %s305_s0, 128, %s17_s10, [#allocation3]  }
   0xd   :  { %s236_s16 = scalar_lea.vmem %s26_s12, 2048  ;;  %p241_p6 = scmp.lt.s32.totalorder %s26_s12, %s26_s12 }
   0xe   :  { %p237_p5 = scmp.ne.s32.totalorder %s26_s12, %s236_s16  ;;  %p242_p7 = scmp.lt.s32.totalorder %s236_s16, %s236_s16 }
  0x10   :  { %p243_p8 = por %p242_p7, %p241_p6 }
  0x12   :  { %p244_p9 = pnand %p243_p8, %p237_p5 }
  0x14   :  { %247 = shalt.err (!%p244_p9)
}
  0x15   :  { %s276_s17 = smov 128   ;;  %s277_s18 = smov 8  }
  0x16   :  { %31 = dma.hbm_to_vmem [thread:$0]  %s306_s1, 2048, %s26_s12, [#allocation6], %s276_s17, %s276_s17, %s277_s18  }
  0x17   :  { %268 = dma.done.wait [#allocation3], 128  }
  0x18   :  { %269 = vsyncadd [#allocation3], 4294967168 }
  0x19   :  { %270 = dma.done.wait [#allocation6], 2048  }
  0x1a   :  { %271 = vsyncadd [#allocation6], 4294965248  ;;  %v278_v0 = vmov 0.0   ;;  %vm279_vm0 = vmmov 0   ;;  %v60_v1 = vld [vmem:[#allocation5 + $0x78] sm:$0xff]  ;;  %v59_v2 = vld [vmem:[#allocation5 + $0x70] sm:$0xff] }
  0x1b   :  { %166 = vmatprep.subr.mxu0 %v278_v0  ;;  %198 = vmatprep.mubr.msk.f32.mxu0 %vm279_vm0, %v278_v0  ;;  %v58_v3 = vld [vmem:[#allocation5 + $0x68] sm:$0xff]  ;;  %v57_v4 = vld [vmem:[#allocation5 + $0x60] sm:$0xff]  ;;  %v56_v5 = vld [vmem:[#allocation5 + $0x58] sm:$0xff]  ;;  %s280_s0 = smov [#allocation7]  }
  0x1c   :  { %167 = vmatpush3.msra.mxu0 %v60_v1  ;;  %v55_v6 = vld [vmem:[#allocation5 + $0x50] sm:$0xff]  ;;  %v54_v7 = vld [vmem:[#allocation5 + $0x48] sm:$0xff]  ;;  %v53_v8 = vld [vmem:[#allocation5 + $0x40] sm:$0xff]  ;;  %s139_s1 = sshll.u32 %s280_s0, 4  ;;  %s140_s1 = int_to_ptr.vmem [resolvable:$true] %s139_s1 }
  0x1d   :  { %168 = vmatprep.subr.mxu0 %v278_v0  ;;  %v52_v9 = vld [vmem:[#allocation5 + $0x38] sm:$0xff]  ;;  %v51_v10 = vld [vmem:[#allocation5 + $0x30] sm:$0xff]  ;;  %v50_v11 = vld [vmem:[#allocation5 + $0x28] sm:$0xff]  ;;  %s248_s21 = scalar_lea.vmem %s140_s1, 128  ;;  %p253_p11 = scmp.lt.s32.totalorder %s140_s1, %s140_s1 }
  0x1e   :  { %169 = vmatpush3.msra.mxu0 %v59_v2  ;;  %v49_v12 = vld [vmem:[#allocation5 + $0x20] sm:$0xff]  ;;  %v48_v13 = vld [vmem:[#allocation5 + $0x18] sm:$0xff]  ;;  %v47_v14 = vld [vmem:[#allocation5 + $0x10] sm:$0xff]  ;;  %p249_p10 = scmp.ne.s32.totalorder %s140_s1, %s248_s21  ;;  %p254_p12 = scmp.lt.s32.totalorder %s248_s21, %s248_s21 }
  0x1f   :  { %170 = vmatprep.subr.mxu0 %v278_v0  ;;  %v46_v15 = vld [vmem:[#allocation5 + $0x8] sm:$0xff]  ;;  %v45_v16 = vld [vmem:[#allocation5] sm:$0xff]  ;;  %v44_v17 = vld [vmem:[#allocation2] sm:$0xff] }
  0x20   :  { %171 = vmatpush3.msra.mxu0 %v58_v3  ;;  %p255_p13 = por %p254_p12, %p253_p11 }
  0x21   :  { %172 = vmatprep.subr.mxu0 %v278_v0 }
  0x22   :  { %173 = vmatpush3.msra.mxu0 %v57_v4  ;;  %p256_p0 = pnand %p255_p13, %p249_p10 }
  0x23   :  { %174 = vmatprep.subr.mxu0 %v278_v0 }
  0x24   :  { %175 = vmatpush3.msra.mxu0 %v56_v5 }
  0x25   :  { %176 = vmatprep.subr.mxu0 %v278_v0 }
  0x26   :  { %177 = vmatpush3.msra.mxu0 %v55_v6 }
  0x27   :  { %178 = vmatprep.subr.mxu0 %v278_v0 }
  0x28   :  { %179 = vmatpush3.msra.mxu0 %v54_v7 }
  0x29   :  { %180 = vmatprep.subr.mxu0 %v278_v0 }
  0x2a   :  { %181 = vmatpush3.msra.mxu0 %v53_v8 }
  0x2b   :  { %182 = vmatprep.subr.mxu0 %v278_v0 }
  0x2c   :  { %183 = vmatpush3.msra.mxu0 %v52_v9 }
  0x2d   :  { %184 = vmatprep.subr.mxu0 %v278_v0 }
  0x2e   :  { %185 = vmatpush3.msra.mxu0 %v51_v10 }
  0x2f   :  { %186 = vmatprep.subr.mxu0 %v278_v0 }
  0x30   :  { %187 = vmatpush3.msra.mxu0 %v50_v11 }
  0x31   :  { %188 = vmatprep.subr.mxu0 %v278_v0 }
  0x32   :  { %189 = vmatpush3.msra.mxu0 %v49_v12 }
  0x33   :  { %190 = vmatprep.subr.mxu0 %v278_v0 }
  0x34   :  { %191 = vmatpush3.msra.mxu0 %v48_v13 }
  0x35   :  { %192 = vmatprep.subr.mxu0 %v278_v0 }
  0x36   :  { %193 = vmatpush3.msra.mxu0 %v47_v14 }
  0x37   :  { %194 = vmatprep.subr.mxu0 %v278_v0 }
  0x38   :  { %195 = vmatpush3.msra.mxu0 %v46_v15 }
  0x39   :  { %196 = vmatprep.subr.mxu0 %v278_v0 }
  0x3a   :  { %197 = vmatpush3.msra.mxu0 %v45_v16 }
  0x3b   :  { %199 = vmatmul.mubr.f32.vlgmr.msra.gmra.mxu0 %v44_v17 }
  0xfb   :  { %v127_v18 = vpop.f32.mrf.mxu0 }
  0xfc   :  { %132 = vst [vmem:[#allocation7] sm:$0xff] %v127_v18 }
  0xfd   :  { %v200_v19 = vpop.f32.mrf.mxu0 }
  0xfe   :  { %259 = shalt.err (!%p256_p0)
}
  0xff   :  { %142 = dma.vmem_to_hbm [thread:$0]  %s140_s1, 128, %s307_s2, [#allocation4]  }
 0x100   :  { %272 = dma.done.wait [#allocation4], 128  }
 0x101   :  { %273 = vsyncadd [#allocation4], 4294967168 }
 0x102   :  { %146 = vsyncpa [#allocation3], 1 }
 0x103   :  { %147 = vsyncpa [#allocation6], 1 }
 0x104   :  { %148 = vsyncpa [#allocation4], 1 }

</bundles_post_ra>
